<compile_context>
chip_gen: v7x
topology: tpu7x:2x2x1
jax: 0.10.0
libtpu: 0.0.40
codegen_flags: <defaults>
</compile_context>

<pallas_src>
import functools

import jax
import jax.numpy as jnp
from jax import lax
from jax.experimental import pallas as pl
from jax.experimental.pallas import tpu as pltpu


def _round_up(v, m):
    return ((v + m - 1) // m) * m


def _codebook_mapper_kernel(x_ref, cb_ref, out_ref, *, tau, k_real):
    # x_ref:  (TM, D_pad) row tile of inputs
    # cb_ref: (K_pad, D_pad) full (padded) codebook, resident across grid steps
    # out_ref:(TM, D_pad) tile of quantized outputs
    x = x_ref[...]
    cb = cb_ref[...]

    # --- F.normalize(x, dim=1) fused with the 1/tau temperature -----------------
    # max(||x||, 1e-12)^2 == max(sum(x^2), 1e-24), so rsqrt of the clamped squared
    # norm preserves F.normalize semantics exactly. Keep this math in f32.
    xf = x.astype(jnp.float32)
    sumsq = jnp.sum(xf * xf, axis=1, keepdims=True)
    row_scale = lax.rsqrt(jnp.maximum(sumsq, 1e-24)) * (1.0 / tau)
    # Feed the MXU in the input dtype (bf16 in -> bf16 matmul, f32 accumulate).
    x_scaled = (xf * row_scale).astype(x.dtype)

    # --- sims = x_norm @ cb.T / tau: contract on D of both operands (no .T) -----
    sims = lax.dot_general(
        x_scaled, cb,
        dimension_numbers=(((1,), (1,)), ((), ())),
        preferred_element_type=jnp.float32)          # (TM, K_pad) f32

    # Padded (all-zero) codebook rows must not contribute to the softmax.
    k_pad = sims.shape[1]
    if k_real < k_pad:
        col = lax.broadcasted_iota(jnp.int32, sims.shape, 1)
        sims = jnp.where(col < k_real, sims, -1e30)

    # --- softmax over the codebook axis, normalization deferred -----------------
    m = jnp.max(sims, axis=1, keepdims=True)
    e = jnp.exp(sims - m)                            # (TM, K_pad) f32
    denom = jnp.sum(e, axis=1, keepdims=True)        # (TM, 1)     f32

    # --- quantized = softmax(sims) @ cb = (e @ cb) * (1 / denom) ----------------
    q = jnp.dot(e.astype(cb.dtype), cb, preferred_element_type=jnp.float32)
    # approx=False keeps tight numerics; flip to approx=True (EUP) if ~1e-3 rel is OK.
    q = q * pl.reciprocal(denom, approx=False)
    out_ref[...] = q.astype(out_ref.dtype)


def codebook_mapper_forward(x, codebook, tau=0.07, *, tm=256,
                            single_buffer_codebook=True,
                            vmem_budget_bytes=24 * 1024 * 1024):
    """x: (N, D), codebook: (K, D). Returns quantized (N, D)."""
    N, D = x.shape
    K, D2 = codebook.shape
    assert D == D2, "feature dims must match"

    # Lane-dense layout: pad the feature dim (lane axis) and codebook rows to
    # multiples of 128. Zero feature padding changes neither norms nor dots;
    # padded codebook rows are masked inside the kernel.
    d_pad = _round_up(D, 128)
    k_pad = _round_up(K, 128)

    # Fixed row tile (multiple of 8 sublanes), never defaulting to tm=N.
    tm = max(8, _round_up(min(int(tm), N), 8))

    cb_bufs = 1 if single_buffer_codebook else 2
    itm_x = jnp.dtype(x.dtype).itemsize
    itm_cb = jnp.dtype(codebook.dtype).itemsize

    def vmem_estimate(tile):
        x_bytes = 2 * tile * d_pad * itm_x            # double-buffered input tile
        out_bytes = 2 * tile * d_pad * itm_x          # double-buffered output tile
        cb_bytes = cb_bufs * k_pad * d_pad * itm_cb   # resident codebook
        live = tile * (2 * k_pad + 3 * d_pad) * 4     # f32 intermediates (sims, e, q, ...)
        return x_bytes + out_bytes + cb_bytes + live

    # Shrink the row tile until the estimate fits a v7x-safe (64 MiB VMEM) budget.
    while tm > 8 and vmem_estimate(tm) > vmem_budget_bytes:
        tm = max(8, _round_up(tm // 2, 8))

    n_pad = _round_up(N, tm)
    grid = n_pad // tm

    x_p = x
    if (n_pad, d_pad) != (N, D):
        x_p = jnp.pad(x, ((0, n_pad - N), (0, d_pad - D)))
    cb_p = codebook
    if (k_pad, d_pad) != (K, D):
        cb_p = jnp.pad(codebook, ((0, k_pad - K), (0, d_pad - D)))

    kernel = functools.partial(_codebook_mapper_kernel, tau=float(tau), k_real=K)
    vmem_limit = min(64 * 1024 * 1024,
                     max(32 * 1024 * 1024, 2 * vmem_estimate(tm)))

    def build_and_run(cb_pipeline_mode):
        if cb_pipeline_mode is None:
            cb_spec = pl.BlockSpec((k_pad, d_pad), lambda i: (0, 0))
        else:
            # Constant index_map: single buffer is enough (saves K*D*dtype of VMEM).
            cb_spec = pl.BlockSpec((k_pad, d_pad), lambda i: (0, 0),
                                   pipeline_mode=cb_pipeline_mode)
        return pl.pallas_call(
            kernel,
            out_shape=jax.ShapeDtypeStruct((n_pad, d_pad), x.dtype),
            grid_spec=pltpu.PrefetchScalarGridSpec(
                num_scalar_prefetch=0,
                grid=(grid,),
                in_specs=[
                    pl.BlockSpec((tm, d_pad), lambda i: (i, 0)),  # x row tile
                    cb_spec,                                      # resident codebook
                ],
                out_specs=pl.BlockSpec((tm, d_pad), lambda i: (i, 0)),
            ),
            compiler_params=pltpu.CompilerParams(
                dimension_semantics=("parallel",),
                vmem_limit_bytes=vmem_limit,
            ),
        )(x_p, cb_p)

    if single_buffer_codebook:
        try:
            out_p = jax.block_until_ready(build_and_run(pl.Buffered(1)))
        except Exception:
            # Defensive fallback for jax builds without single-buffer pipeline_mode.
            out_p = build_and_run(None)
    else:
        out_p = build_and_run(None)

    return out_p[:N, :D]


def _reference_forward(x, codebook, tau):
    x = x.astype(jnp.float32)
    cb = codebook.astype(jnp.float32)
    x_n = x / jnp.maximum(jnp.linalg.norm(x, axis=1, keepdims=True), 1e-12)
    sims = x_n @ cb.T / tau
    soft = jax.nn.softmax(sims, axis=1)
    return soft @ cb


if __name__ == "__main__":
    # Module hyperparameters (small, consistent with the module's __init__).
    codebook_size = 16
    feature_dim = 32
    tau = 0.07
    batch = 40  # deliberately not a multiple of the row tile (exercises row padding)

    key = jax.random.PRNGKey(0)
    k_cb, k_x = jax.random.split(key)

    # Deterministic codebook init: uniform in [-1/K, 1/K), then L2-normalize rows.
    init_bound = 1.0 / codebook_size
    codebook = jax.random.uniform(
        k_cb, (codebook_size, feature_dim), dtype=jnp.float32,
        minval=-init_bound, maxval=init_bound)
    codebook = codebook / jnp.maximum(
        jnp.linalg.norm(codebook, axis=1, keepdims=True), 1e-12)

    x = jax.random.normal(k_x, (batch, feature_dim), dtype=jnp.float32)

    # tm=16 -> a 3-step grid at this tiny batch: exercises pipelining, row padding
    # (40->48), lane padding (D 32->128) and codebook-row padding/masking (K 16->128).
    out = codebook_mapper_forward(x, codebook, tau, tm=16)
    out = jax.block_until_ready(out)

    ref = _reference_forward(x, codebook, tau)
    assert out.shape == (batch, feature_dim)
    assert jnp.allclose(out, ref, atol=2e-5, rtol=2e-5), "mismatch vs reference"

    print("KERNEL_OK")
</pallas_src>

<mosaic_0001>
module attributes {stable_mosaic.version = 11 : i64} {
  func.func @_codebook_mapper_kernel(%arg0: i32, %arg1: memref<16x128xf32, #tpu.memory_space<vmem>>, %arg2: memref<128x128xf32, #tpu.memory_space<vmem>>, %arg3: memref<16x128xf32, #tpu.memory_space<vmem>>) attributes {dimension_semantics = [#tpu.dimension_semantics<parallel>], iteration_bounds = array<i64: 3>, scalar_prefetch = 0 : i64, scratch_operands = 0 : i64, tpu.core_type = #tpu.core_type<tc>, window_params = [{transform_indices = @transform_0, window_bounds = array<i64: 16, 128>}, {pipeline_mode = #tpu.pipeline_mode<synchronous>, transform_indices = @transform_1, window_bounds = array<i64: 128, 128>}, {transform_indices = @transform_2, window_bounds = array<i64: 16, 128>}]} {
    %c0 = arith.constant 0 : index
    %c0_0 = arith.constant 0 : index
    %0 = vector.load %arg1[%c0, %c0_0] : memref<16x128xf32, #tpu.memory_space<vmem>>, vector<16x128xf32>
    %c0_1 = arith.constant 0 : index
    %c0_2 = arith.constant 0 : index
    %1 = vector.load %arg2[%c0_1, %c0_2] : memref<128x128xf32, #tpu.memory_space<vmem>>, vector<128x128xf32>
    %2 = arith.mulf %0, %0 : vector<16x128xf32>
    %cst = arith.constant dense<0.000000e+00> : vector<16xf32>
    %3 = vector.multi_reduction <add>, %2, %cst [1] : vector<16x128xf32> to vector<16xf32>
    %4 = vector.shape_cast %3 : vector<16xf32> to vector<16x1xf32>
    %cst_3 = arith.constant 1.000000e-24 : f32
    %5 = vector.broadcast %cst_3 : f32 to vector<16x1xf32>
    %6 = arith.maximumf %4, %5 : vector<16x1xf32>
    %7 = math.rsqrt %6 : vector<16x1xf32>
    %cst_4 = arith.constant 14.2857141 : f32
    %8 = vector.broadcast %cst_4 : f32 to vector<16x1xf32>
    %9 = arith.mulf %7, %8 : vector<16x1xf32>
    %10 = vector.broadcast %9 : vector<16x1xf32> to vector<16x128xf32>
    %11 = arith.mulf %0, %10 : vector<16x128xf32>
    %cst_5 = arith.constant dense<0.000000e+00> : vector<16x128xf32>
    %12 = tpu.matmul %11, %1, %cst_5 {dimension_numbers = #tpu.dot_dimension_numbers<[1], [1], [0], [0], [0, 0, 1, 0], [], []>} : vector<16x128xf32>, vector<128x128xf32>, vector<16x128xf32> -> vector<16x128xf32>
    %13 = tpu.iota {dimensions = array<i32: 1>} : vector<16x128xi32>
    %c16_i32 = arith.constant 16 : i32
    %14 = vector.broadcast %c16_i32 : i32 to vector<16x128xi32>
    %15 = arith.cmpi slt, %13, %14 : vector<16x128xi32>
    %cst_6 = arith.constant -1.000000e+30 : f32
    %16 = vector.broadcast %cst_6 : f32 to vector<16x128xf32>
    %17 = arith.select %15, %12, %16 : vector<16x128xi1>, vector<16x128xf32>
    %cst_7 = arith.constant dense<0xFF800000> : vector<16xf32>
    %18 = vector.multi_reduction <maximumf>, %17, %cst_7 [1] : vector<16x128xf32> to vector<16xf32>
    %19 = vector.shape_cast %18 : vector<16xf32> to vector<16x1xf32>
    %20 = vector.broadcast %19 : vector<16x1xf32> to vector<16x128xf32>
    %21 = arith.subf %17, %20 : vector<16x128xf32>
    %22 = math.exp %21 : vector<16x128xf32>
    %cst_8 = arith.constant dense<0.000000e+00> : vector<16xf32>
    %23 = vector.multi_reduction <add>, %22, %cst_8 [1] : vector<16x128xf32> to vector<16xf32>
    %24 = vector.shape_cast %23 : vector<16xf32> to vector<16x1xf32>
    %cst_9 = arith.constant dense<0.000000e+00> : vector<16x128xf32>
    %25 = tpu.matmul %22, %1, %cst_9 {dimension_numbers = #tpu.dot_dimension_numbers<[1], [0], [0], [1], [0, 0, 1, 1], [], []>} : vector<16x128xf32>, vector<128x128xf32>, vector<16x128xf32> -> vector<16x128xf32>
    %26 = tpu.reciprocal %24 : vector<16x1xf32> -> vector<16x1xf32>
    %27 = vector.broadcast %26 : vector<16x1xf32> to vector<16x128xf32>
    %28 = arith.mulf %25, %27 : vector<16x128xf32>
    %c0_10 = arith.constant 0 : index
    %c0_11 = arith.constant 0 : index
    %29 = vector.load %arg3[%c0_10, %c0_11] : memref<16x128xf32, #tpu.memory_space<vmem>>, vector<16x128xf32>
    tpu.vector_store %arg3[%c0_10, %c0_11], %28 {strides = array<i32>} : memref<16x128xf32, #tpu.memory_space<vmem>>, vector<16x128xf32>,
    return
  }
  func.func @transform_0(%arg0: i32) -> (i32, i32) {
    %c0_i32 = arith.constant 0 : i32
    %c0_i32_0 = arith.constant 0 : i32
    return %arg0, %c0_i32 : i32, i32
  }
  func.func @transform_1(%arg0: i32) -> (i32, i32) {
    %c0_i32 = arith.constant 0 : i32
    %c0_i32_0 = arith.constant 0 : i32
    %c0_i32_1 = arith.constant 0 : i32
    return %c0_i32, %c0_i32_0 : i32, i32
  }
  func.func @transform_2(%arg0: i32) -> (i32, i32) {
    %c0_i32 = arith.constant 0 : i32
    %c0_i32_0 = arith.constant 0 : i32
    return %arg0, %c0_i32 : i32, i32
  }
}

module attributes {stable_mosaic.version = 11 : i64} {
  func.func @_codebook_mapper_kernel(%arg0: i32, %arg1: memref<16x128xf32, #tpu.memory_space<vmem>>, %arg2: memref<128x128xf32, #tpu.memory_space<vmem>>, %arg3: memref<16x128xf32, #tpu.memory_space<vmem>>) attributes {dimension_semantics = [#tpu.dimension_semantics<parallel>], iteration_bounds = array<i64: 3>, scalar_prefetch = 0 : i64, scratch_operands = 0 : i64, tpu.core_type = #tpu.core_type<tc>, window_params = [{transform_indices = @transform_0, window_bounds = array<i64: 16, 128>}, {pipeline_mode = #tpu.pipeline_mode<synchronous>, transform_indices = @transform_1, window_bounds = array<i64: 128, 128>}, {transform_indices = @transform_2, window_bounds = array<i64: 16, 128>}]} {
    %c0 = arith.constant 0 : index
    %c0_0 = arith.constant 0 : index
    %0 = vector.load %arg1[%c0, %c0_0] : memref<16x128xf32, #tpu.memory_space<vmem>>, vector<16x128xf32>
    %c0_1 = arith.constant 0 : index
    %c0_2 = arith.constant 0 : index
    %1 = vector.load %arg2[%c0_1, %c0_2] : memref<128x128xf32, #tpu.memory_space<vmem>>, vector<128x128xf32>
    %2 = arith.mulf %0, %0 : vector<16x128xf32>
    %cst = arith.constant dense<0.000000e+00> : vector<16xf32>
    %3 = vector.multi_reduction <add>, %2, %cst [1] : vector<16x128xf32> to vector<16xf32>
    %4 = vector.shape_cast %3 : vector<16xf32> to vector<16x1xf32>
    %cst_3 = arith.constant 1.000000e-24 : f32
    %5 = vector.broadcast %cst_3 : f32 to vector<16x1xf32>
    %6 = arith.maximumf %4, %5 : vector<16x1xf32>
    %7 = math.rsqrt %6 : vector<16x1xf32>
    %cst_4 = arith.constant 14.2857141 : f32
    %8 = vector.broadcast %cst_4 : f32 to vector<16x1xf32>
    %9 = arith.mulf %7, %8 : vector<16x1xf32>
    %10 = vector.broadcast %9 : vector<16x1xf32> to vector<16x128xf32>
    %11 = arith.mulf %0, %10 : vector<16x128xf32>
    %cst_5 = arith.constant dense<0.000000e+00> : vector<16x128xf32>
    %12 = tpu.matmul %11, %1, %cst_5 {dimension_numbers = #tpu.dot_dimension_numbers<[1], [1], [0], [0], [0, 0, 1, 0], [], []>} : vector<16x128xf32>, vector<128x128xf32>, vector<16x128xf32> -> vector<16x128xf32>
    %13 = tpu.iota {dimensions = array<i32: 1>} : vector<16x128xi32>
    %c16_i32 = arith.constant 16 : i32
    %14 = vector.broadcast %c16_i32 : i32 to vector<16x128xi32>
    %15 = arith.cmpi slt, %13, %14 : vector<16x128xi32>
    %cst_6 = arith.constant -1.000000e+30 : f32
    %16 = vector.broadcast %cst_6 : f32 to vector<16x128xf32>
    %17 = arith.select %15, %12, %16 : vector<16x128xi1>, vector<16x128xf32>
    %cst_7 = arith.constant dense<0xFF800000> : vector<16xf32>
    %18 = vector.multi_reduction <maximumf>, %17, %cst_7 [1] : vector<16x128xf32> to vector<16xf32>
    %19 = vector.shape_cast %18 : vector<16xf32> to vector<16x1xf32>
    %20 = vector.broadcast %19 : vector<16x1xf32> to vector<16x128xf32>
    %21 = arith.subf %17, %20 : vector<16x128xf32>
    %22 = math.exp %21 : vector<16x128xf32>
    %cst_8 = arith.constant dense<0.000000e+00> : vector<16xf32>
    %23 = vector.multi_reduction <add>, %22, %cst_8 [1] : vector<16x128xf32> to vector<16xf32>
    %24 = vector.shape_cast %23 : vector<16xf32> to vector<16x1xf32>
    %cst_9 = arith.constant dense<0.000000e+00> : vector<16x128xf32>
    %25 = tpu.matmul %22, %1, %cst_9 {dimension_numbers = #tpu.dot_dimension_numbers<[1], [0], [0], [1], [0, 0, 1, 1], [], []>} : vector<16x128xf32>, vector<128x128xf32>, vector<16x128xf32> -> vector<16x128xf32>
    %26 = tpu.reciprocal %24 : vector<16x1xf32> -> vector<16x1xf32>
    %27 = vector.broadcast %26 : vector<16x1xf32> to vector<16x128xf32>
    %28 = arith.mulf %25, %27 : vector<16x128xf32>
    %c0_10 = arith.constant 0 : index
    %c0_11 = arith.constant 0 : index
    %29 = vector.load %arg3[%c0_10, %c0_11] : memref<16x128xf32, #tpu.memory_space<vmem>>, vector<16x128xf32>
    tpu.vector_store %arg3[%c0_10, %c0_11], %28 {strides = array<i32>} : memref<16x128xf32, #tpu.memory_space<vmem>>, vector<16x128xf32>,
    return
  }
  func.func @transform_0(%arg0: i32) -> (i32, i32) {
    %c0_i32 = arith.constant 0 : i32
    %c0_i32_0 = arith.constant 0 : i32
    return %arg0, %c0_i32 : i32, i32
  }
  func.func @transform_1(%arg0: i32) -> (i32, i32) {
    %c0_i32 = arith.constant 0 : i32
    %c0_i32_0 = arith.constant 0 : i32
    %c0_i32_1 = arith.constant 0 : i32
    return %c0_i32, %c0_i32_0 : i32, i32
  }
  func.func @transform_2(%arg0: i32) -> (i32, i32) {
    %c0_i32 = arith.constant 0 : i32
    %c0_i32_0 = arith.constant 0 : i32
    return %arg0, %c0_i32 : i32, i32
  }
}

</mosaic_0001>

<bundles_post_ra>
// kernel: tpu_custom_call.1
= control target key start
LH: loop header
LB: loop body
LE: loop exit
PB: predicated region body
PF: predicated region fallthrough
CT: control target
= control target key end

     0   :  { %7 = vsyncpa [#allocation3], 0  ;;  %s1108_s0 = inlined_call_operand.hbm [shape: f32[48,128], index: 0, kind: input, shape index: {}]   ;;  %s1109_s1 = inlined_call_operand.hbm [shape: f32[128,128], index: 1, kind: input, shape index: {}]   ;;  %s1110_s2 = inlined_call_operand.hbm [shape: f32[48,128], index: 2, kind: output, shape index: {}]  }
   0x1   :  { %9 = vsyncpa [#allocation3 + $0x1], 0 }
   0x2   :  { %10 = vsyncpa [#allocation6], 0 }
   0x3   :  { %11 = vsyncpa [#allocation4], 0 }
   0x4   :  { %13 = vsyncpa [#allocation4 + $0x1], 0  ;;  %s896_s9 = smov 0   ;;  %s898_s10 = smov 0  }
   0x5   :  { %s900_s11 = smov 0   ;;  %s902_s12 = smov 0  }
   0x6 LB: > { %s917_s13 = sadd.s32 4294967295, %s872_s12   ;;  %s483_s14 = sadd.s32 4294967294, %s872_s12   ;;  %s872_s12 = sphi %s902_s12, %s1129_s12   ;;  %s868_s11 = sphi %s900_s11, %s1128_s11   ;;  %s864_s10 = sphi %s898_s10, %s1127_s10   ;;  %s860_s9 = sphi %s896_s9, %s1126_s9  }
   0x7   : > { %p39_p0 = scmp.ne.s32.totalorder %s864_s10, %s860_s9  ;;  %p1111_p1 = scmp.eq.s32.totalorder %s917_s13, 0 }
   0x8   : > { %p90_p3 = scmp.eq.s32.totalorder %s483_s14, 2  ;;  %p484_p5 = scmp.ge.s32.totalorder %s872_s12, 1 }
   0x9   : > { %p926_p4 = por %p1111_p1, %p39_p0  ;;  %p97_p7 = scmp.lt.s32.totalorder %s872_s12, 4 }
   0xa   : > { %p931_p6 = por %p90_p3, %p39_p0  ;;  %s874_s18 = smov [#allocation5]  }
   0xb   : > { %s1114_s15 = scalar_select %p926_p4, 1, 0 }
   0xc   : > { %s1115_s16 = scalar_select %p931_p6, 1, 0 }
   0xd   : > { %p936_p8 = pnand %p484_p5, %p97_p7  ;;  %s109_s19 = sshll.u32 %s874_s18, 4  ;;  %s110_s19 = int_to_ptr.vmem [resolvable:$true] %s109_s19 }
   0xe   : > { %s949_s21 = sadd.s32 1, %s872_s12   ;;  %s26_s22 = sadd.s32 1, %s868_s11 }
   0xf   : > { %s1116_s17 = scalar_select %p936_p8, 1, 0 }
  0x10   : > { %p679_p9 = pneg %p936_p8  ;;  %s23_s23 = ssub.s32 %s872_s12, %s949_s21 }
  0x11   : > { %s744_s26 = scalar_lea.hbm %s1109_s1, 2048 }
  0x12   : > { %p944_p10 = pnand %p679_p9, %p1111_p1  ;;  %p745_p11 = scmp.ne.s32.totalorder %s1109_s1, %s744_s26 }
  0x13   : > { %p751_p3 = scmp.lt.u32.totalorder %s744_s26, %s1109_s1 }
  0x14   : > { %p746_p12 = pneg %p944_p10 }
  0x16   : > { %p747_p13 = pnand %p746_p12, %p745_p11 }
  0x18   : > { %p748_p0 = pneg %p747_p13 }
  0x1a   : > { %p753_p5 = pnand %p751_p3, %p748_p0 }
  0x1c   : > { %756 = shalt.err (!%p753_p5)
}
  0x1d   : > { %s757_s3 = scalar_lea.vmem %s110_s19, 2048  ;;  %p765_p2 = scmp.lt.s32.totalorder %s110_s19, %s110_s19 }
  0x1e   : > { %p758_p7 = scmp.ne.s32.totalorder %s110_s19, %s757_s3  ;;  %p766_p6 = scmp.lt.s32.totalorder %s757_s3, %s757_s3 }
  0x20   : > { %p760_p9 = pnand %p758_p7, %p746_p12  ;;  %p767_p4 = por %p766_p6, %p765_p2 }
  0x22   : > { %p761_p1 = pneg %p760_p9 }
  0x24   : > { %p768_p8 = pnand %p767_p4, %p761_p1 }
  0x26   : > { %771 = shalt.err (!%p768_p8)
}
  0x27   : > { %s875_s4 = smov 128   ;;  %s876_s5 = smov 8  }
  0x28   : > { %682 = dma.hbm_to_vmem [thread:$0]  (!%p944_p10), %s1109_s1, 2048, %s110_s19, [#allocation6], %s875_s4, %s875_s4, %s876_s5  }
  0x29   : > { %p24_p1 = scmp.eq.s32.totalorder %s23_s23, 0  ;;  %p33_p2 = scmp.ne.s32.totalorder %s868_s11, %s864_s10 }
  0x2a   : > { %p34_p4 = scmp.eq.s32.totalorder %s872_s12, 0  ;;  %p692_p6 = scmp.lt.s32.totalorder %s872_s12, 3 }
  0x2b   : > { %s978_s8 = scalar_select %p24_p1, %s868_s11, %s26_s22  }
  0x2c   : > { %p35_p8 = por %p34_p4, %p33_p2  ;;  %p1118_p11 = scmp.eq.s32.totalorder %s917_s13, 2 }
  0x2d   : > { %s123_s18 = sand.u32 1, %s868_s11   ;;  %s499_s20 = sshll.u32 %s872_s12, 8 }
  0x2e   : > { %p982_p12 = por %p1118_p11, %p33_p2  ;;  %s487_s24 = sshll.u32 %s123_s18, 4 }
  0x2f   : > { %s991_s27 = scalar_lea.hbm %s1108_s0, %s499_s20  ;;  %s127_s19 = scalar_lea.vmem [#allocation2], %s487_s24 }
  0x30   : > { %s134_s22 = sshll.u32 %s127_s19, 4  ;;  %p993_p10 = pnand %p692_p6, %p35_p8  ;;  %s997_s22 = int_to_ptr.vmem [resolvable:$true] %s134_s22 }
  0x31   : > { %s999_s28 = scalar_lea.sflag [#allocation3], %s123_s18  ;;  %s772_s29 = scalar_lea.hbm %s991_s27, 256 }
  0x32   : > { %p773_p13 = scmp.ne.s32.totalorder %s991_s27, %s772_s29  ;;  %p774_p0 = pneg %p993_p10 }
  0x33   : > { %s777_s6 = scalar_lea.hbm %s1108_s0, 768  ;;  %p778_p7 = scmp.lt.u32.totalorder %s991_s27, %s1108_s0 }
  0x34   : > { %p775_p3 = pnand %p774_p0, %p773_p13  ;;  %p779_p9 = scmp.lt.u32.totalorder %s777_s6, %s772_s29 }
  0x35   : > { %p781_p2 = scmp.lt.u32.totalorder %s772_s29, %s991_s27 }
  0x36   : > { %p776_p5 = pneg %p775_p3  ;;  %p780_p1 = por %p779_p9, %p778_p7 }
  0x38   : > { %p782_p4 = por %p781_p2, %p780_p1 }
  0x3a   : > { %p783_p6 = pnand %p782_p4, %p776_p5 }
  0x3c   : > { %786 = shalt.err (!%p783_p6)
}
  0x3d   : > { %s787_s18 = scalar_lea.vmem %s997_s22, 256  ;;  %s877_s24 = smov [#allocation2]  }
  0x3e   : > { %p788_p8 = scmp.ne.s32.totalorder %s997_s22, %s787_s18  ;;  %s792_s25 = sshll.u32 %s877_s24, 4  ;;  %s793_s25 = int_to_ptr.vmem [resolvable:$false] %s792_s25 }
  0x3f   : > { %s794_s26 = scalar_lea.vmem %s793_s25, 512  ;;  %p795_p3 = scmp.lt.s32.totalorder %s997_s22, %s793_s25 }
  0x40   : > { %p790_p11 = pnand %p788_p8, %p774_p0  ;;  %p796_p7 = scmp.lt.s32.totalorder %s794_s26, %s787_s18 }
  0x42   : > { %p791_p13 = pneg %p790_p11  ;;  %p797_p9 = por %p796_p7, %p795_p3 }
  0x44   : > { %p798_p1 = pnand %p797_p9, %p791_p13 }
  0x46   : > { %801 = shalt.err (!%p798_p1)
}
  0x47   : > { %686 = dma.hbm_to_vmem [thread:$0]  (!%p993_p10), %s991_s27, 256, %s997_s22, %s999_s28, %s875_s4, %s875_s4, %s876_s5  }
  0x48   : > { %p1121_p0 = scmp.ne.s32.totalorder %s1116_s17, 0 }
  0x49   : > { %s1033_s19 = sand.u32 (!%p1121_p0), 1, %s864_s10   ;;  %p1122_p5 = scmp.ne.s32.totalorder (!%p1121_p0), %s1114_s15, 0 }
  0x4a   : > { %146 = sbr.rel (%p1121_p0) target bundleno = 856 (0x358), region = 28  ;;  %s491_s29 = sshll.u32 (!%p1121_p0), %s1033_s19, 4 }
  0x4b   : > { %s149_s30 = scalar_lea.sflag (!%p1121_p0), [#allocation3], %s1033_s19  ;;  %s152_s23 = scalar_lea.vmem (!%p1121_p0), [#allocation2], %s491_s29 }
  0x51   : > { %847 = dma.done.wait (%p1122_p5), %s149_s30, 256  }
  0x52   : > { %849 = vsyncadd (%p1122_p5), %s149_s30, 4294967040  ;;  %p1123_p10 = scmp.eq.s32.totalorder %s917_s13, 0 }
  0x54   : > { %851 = dma.done.wait (%p1123_p10), [#allocation6], 2048   ;;  %p1124_p2 = pmov %p1123_p10 }
  0x55   : > { %v1047_v0 = vld [vmem:[%s152_s23] sm:$0xff]  ;;  %v1049_v1 = vld [vmem:[%s152_s23 + $0x8] sm:$0xff]  ;;  %v286_v38 = vlaneseq  ;;  %s176_s15 = scalar_lea.vmem [#allocation7], %s491_s29  ;;  %s500_s4 = sshll.u32 %s917_s13, 8 }
  0x56   : > { %853 = vsyncadd (%p1124_p2), [#allocation6], 4294965248  ;;  %v181_v2 = vld [vmem:[#allocation5] sm:$0xff]  ;;  %v197_v3 = vmul.f32 %v1047_v0, %v1047_v0  ;;  %v182_v4 = vld [vmem:[#allocation5 + $0x8] sm:$0xff]  ;;  %v198_v9 = vmul.f32 %v1049_v1, %v1049_v1  ;;  %s400_s17 = sshll.u32 %s176_s15, 4  ;;  %s1065_s22 = scalar_lea.hbm %s1110_s2, %s500_s4  ;;  %s1060_s17 = int_to_ptr.vmem [resolvable:$true] %s400_s17 }
  0x57   : > { %v183_v5 = vld [vmem:[#allocation5 + $0x10] sm:$0xff]  ;;  %v184_v6 = vld [vmem:[#allocation5 + $0x18] sm:$0xff]  ;;  %v607_v7 = vpack.c.bf16 %v182_v4, %v181_v2  ;;  %v185_v10 = vld [vmem:[#allocation5 + $0x20] sm:$0xff]  ;;  %v287_v39 = vand.u32 127, %v286_v38  ;;  %s387_s28 = scalar_lea.sflag [#allocation4], %s1033_s19  ;;  %s802_s13 = scalar_lea.vmem %s1060_s17, 256 }
  0x58   : > { %v611_v8 = vpack.c.bf16 %v184_v6, %v183_v5  ;;  %199 = vadd.xlane.f32.xlu0 %v197_v3  ;;  %v186_v11 = vld [vmem:[#allocation5 + $0x28] sm:$0xff]  ;;  %v187_v13 = vld [vmem:[#allocation5 + $0x30] sm:$0xff]  ;;  %v188_v14 = vld [vmem:[#allocation5 + $0x38] sm:$0xff]  ;;  %p803_p4 = scmp.ne.s32.totalorder %s1060_s17, %s802_s13  ;;  %s878_s3 = smov [#allocation7]  }
  0x59   : > { %608 = vmatprep.subr.bf16.mxu0 %v607_v7  ;;  %640 = vmatprep.subr.bf16.mxu1 %v607_v7  ;;  %v615_v12 = vpack.c.bf16 %v186_v11, %v185_v10  ;;  %v619_v15 = vpack.c.bf16 %v188_v14, %v187_v13  ;;  %v189_v16 = vld [vmem:[#allocation5 + $0x40] sm:$0xff]  ;;  %v190_v17 = vld [vmem:[#allocation5 + $0x48] sm:$0xff]  ;;  %v191_v19 = vld [vmem:[#allocation5 + $0x50] sm:$0xff]  ;;  %vm288_vm0 = vcmp.lt.s32.totalorder %v287_v39, 16  ;;  %s806_s6 = sshll.u32 %s878_s3, 4  ;;  %s807_s6 = int_to_ptr.vmem [resolvable:$false] %s806_s6 }
  0x5a   : > { %610 = vmatpush3.bf16.xpose.msra.mxu0 %v607_v7  ;;  %642 = vmatpush3.bf16.msra.mxu1 %v607_v7  ;;  %v623_v18 = vpack.c.bf16 %v190_v17, %v189_v16  ;;  %v192_v20 = vld [vmem:[#allocation5 + $0x58] sm:$0xff]  ;;  %v193_v22 = vld [vmem:[#allocation5 + $0x60] sm:$0xff]  ;;  %v194_v23 = vld [vmem:[#allocation5 + $0x68] sm:$0xff]  ;;  %p804_p6 = pnand %p803_p4, %p982_p12  ;;  %s808_s7 = scalar_lea.vmem %s807_s6, 512 }
  0x5b   : > { %612 = vmatprep.subr.bf16.mxu0 %v611_v8  ;;  %644 = vmatprep.subr.bf16.mxu1 %v611_v8  ;;  %v627_v21 = vpack.c.bf16 %v192_v20, %v191_v19  ;;  %v631_v24 = vpack.c.bf16 %v194_v23, %v193_v22  ;;  %v195_v25 = vld [vmem:[#allocation5 + $0x70] sm:$0xff]  ;;  %v196_v26 = vld [vmem:[#allocation5 + $0x78] sm:$0xff]  ;;  %p809_p11 = scmp.lt.s32.totalorder %s1060_s17, %s807_s6  ;;  %p810_p13 = scmp.lt.s32.totalorder %s808_s7, %s802_s13 }
  0x5c   : > { %201 = vadd.xlane.f32.xlu0 %v198_v9  ;;  %v635_v27 = vpack.c.bf16 %v196_v26, %v195_v25  ;;  %p805_p8 = pneg %p804_p6 }
  0x5d   : > { %p811_p3 = por %p810_p13, %p809_p11 }
  0x5e   : > { %646 = vmatpush3.bf16.msra.mxu1 %v611_v8 }
  0x5f   : > { %648 = vmatprep.subr.bf16.mxu1 %v615_v12  ;;  %p812_p7 = pnand %p811_p3, %p805_p8 }
  0x62   : > { %614 = vmatpush3.bf16.xpose.msra.mxu0 %v611_v8  ;;  %650 = vmatpush3.bf16.msra.mxu1 %v615_v12 }
  0x63   : > { %616 = vmatprep.subr.bf16.mxu0 %v615_v12  ;;  %652 = vmatprep.subr.bf16.mxu1 %v619_v15 }
  0x66   : > { %654 = vmatpush3.bf16.msra.mxu1 %v619_v15 }
  0x67   : > { %656 = vmatprep.subr.bf16.mxu1 %v623_v18 }
  0x6a   : > { %618 = vmatpush3.bf16.xpose.msra.mxu0 %v615_v12  ;;  %658 = vmatpush3.bf16.msra.mxu1 %v623_v18 }
  0x6b   : > { %620 = vmatprep.subr.bf16.mxu0 %v619_v15  ;;  %660 = vmatprep.subr.bf16.mxu1 %v627_v21 }
  0x6e   : > { %662 = vmatpush3.bf16.msra.mxu1 %v627_v21 }
  0x6f   : > { %664 = vmatprep.subr.bf16.mxu1 %v631_v24 }
  0x72   : > { %622 = vmatpush3.bf16.xpose.msra.mxu0 %v619_v15  ;;  %666 = vmatpush3.bf16.msra.mxu1 %v631_v24 }
  0x73   : > { %624 = vmatprep.subr.bf16.mxu0 %v623_v18  ;;  %668 = vmatprep.subr.bf16.mxu1 %v635_v27 }
  0x76   : > { %670 = vmatpush3.bf16.msra.mxu1 %v635_v27 }
  0x7a   : > { %626 = vmatpush3.bf16.xpose.msra.mxu0 %v623_v18 }
  0x7b   : > { %628 = vmatprep.subr.bf16.mxu0 %v627_v21 }
  0x82   : > { %630 = vmatpush3.bf16.xpose.msra.mxu0 %v627_v21 }
  0x83   : > { %632 = vmatprep.subr.bf16.mxu0 %v631_v24 }
  0x8a   : > { %634 = vmatpush3.bf16.xpose.msra.mxu0 %v631_v24 }
  0x8b   : > { %636 = vmatprep.subr.bf16.mxu0 %v635_v27 }
  0x92   : > { %638 = vmatpush3.bf16.xpose.msra.mxu0 %v635_v27 }
  0xe5   : > { %v200_v28 = vpop.xlane.xlu0 %199 }
  0xe6   : > { %v203_v29 = vmax.f32 %v200_v28, 1e-24 }
  0xe8   : > { %732 = vrsqrt.f32 %v203_v29 }
  0xe9   : > { %v202_v30 = vpop.xlane.xlu0 %201 }
  0xea   : > { %v204_v31 = vmax.f32 %v202_v30, 1e-24 }
  0xec   : > { %734 = vrsqrt.f32 %v204_v31 }
  0xf2   : > { %v733_v32 = vpop.eup %732 }
  0xf3   : > { %v207_v33 = vmul.f32 14.285714, %v733_v32 }
  0xf5   : > { %v209_v34 = vmul.f32 %v207_v33, %v1047_v0 }
  0xf6   : > { %v735_v35 = vpop.eup %734 }
  0xf7   : > { %v208_v36 = vmul.f32 14.285714, %v735_v35  ;;  %569 = vmatprep.mubr.f32.mxu0 %v209_v34 }
  0xf9   : > { %v210_v37 = vmul.f32 %v208_v36, %v1049_v1 }
  0xfb   : > { %570 = vmatmul.mubr.f32.vlgmr.msra.gmra.mrb[0].mxu0 %v210_v37 }
 0x1ce   : > { %v571_v40 = vpop.f32.mrb[0].mxu0 }
 0x1cf   : > { %v277_v41 = vpop.f32.mrb[1].mxu0  ;;  %v290_v43 = vsel %vm288_vm0, %v571_v40, -1e+30 }
 0x1d0   : > { %v289_v42 = vsel %vm288_vm0, %v277_v41, -1e+30 }
 0x1d1   : > { %291 = vmax.xlane.f32.xlu1 %v289_v42 }
 0x1d5   : > { %293 = vmax.xlane.f32.xlu1 %v290_v43 }
 0x25e   : > { %v292_v44 = vpop.xlane.xlu1 %291 }
 0x25f   : > { %v295_v45 = vsub.f32 %v289_v42, %v292_v44 }
 0x261   : > { %v297_v46 = vmul.f32 1.442695, %v295_v45 }
 0x262   : > { %v294_v47 = vpop.xlane.xlu1 %293 }
 0x263   : > { %736 = vpow2.f32 %v297_v46  ;;  %v296_v48 = vsub.f32 %v290_v43, %v294_v47 }
 0x265   : > { %v299_v49 = vmul.f32 1.442695, %v296_v48 }
 0x267   : > { %738 = vpow2.f32 %v299_v49 }
 0x26d   : > { %v737_v50 = vpop.eup %736 }
 0x26e   : > { %301 = vadd.xlane.f32.xlu0 %v737_v50  ;;  %604 = vmatprep.mubr.f32.mxu1 %v737_v50 }
 0x271   : > { %v739_v51 = vpop.eup %738 }
 0x272   : > { %303 = vadd.xlane.f32.xlu1 %v739_v51  ;;  %605 = vmatmul.mubr.f32.vlgmr.msra.gmra.mrb[0].mxu1 %v739_v51 }
 0x2fb   : > { %v302_v53 = vpop.xlane.xlu0 %301 }
 0x2ff   : > { %v304_v52 = vpop.xlane.xlu1 %303 }
 0x300   : > { %740 = vrcp.f32 %v304_v52 }
 0x301   : > { %742 = vrcp.f32 %v302_v53 }
 0x30a   : > { %v741_v54 = vpop.eup %740 }
 0x30b   : > { %v743_v56 = vpop.eup %742 }
 0x345   : > { %v606_v55 = vpop.f32.mrb[0].mxu1 }
 0x346   : > { %v383_v57 = vmul.f32 %v741_v54, %v606_v55  ;;  %v371_v58 = vpop.f32.mrb[1].mxu1 }
 0x347   : > { %v382_v59 = vmul.f32 %v743_v56, %v371_v58 }
 0x348   : > { %385 = vst [vmem:[%s176_s15 + $0x8] sm:$0xff] %v383_v57 }
 0x349   : > { %384 = vst [vmem:[%s176_s15] sm:$0xff] %v382_v59 }
 0x34a   : > { %815 = shalt.err (!%p812_p7)
}
 0x34b   : > { %s816_s20 = scalar_lea.hbm %s1065_s22, 256  ;;  %s820_s25 = scalar_lea.hbm %s1110_s2, 768 }
 0x34c   : > { %p817_p9 = scmp.ne.s32.totalorder %s1065_s22, %s816_s20  ;;  %p821_p5 = scmp.lt.u32.totalorder %s1065_s22, %s1110_s2 }
 0x34d   : > { %p822_p10 = scmp.lt.u32.totalorder %s820_s25, %s816_s20  ;;  %p824_p4 = scmp.lt.u32.totalorder %s816_s20, %s1065_s22 }
 0x34e   : > { %p818_p1 = pnand %p817_p9, %p982_p12 }
 0x34f   : > { %p823_p2 = por %p822_p10, %p821_p5 }
 0x350   : > { %p819_p0 = pneg %p818_p1 }
 0x351   : > { %p825_p6 = por %p824_p4, %p823_p2 }
 0x353   : > { %p826_p8 = pnand %p825_p6, %p819_p0 }
 0x355   : > { %829 = shalt.err (!%p826_p8)
}
 0x356   : > { %s879_s30 = smov 128   ;;  %s880_s23 = smov 8  }
 0x357   : > { %677 = dma.vmem_to_hbm [thread:$0]  (%p982_p12), %s1060_s17, 256, %s1065_s22, %s387_s28, %s879_s30, %s879_s30, %s880_s23  }
 0x358 PF: > { %p694_p11 = scmp.ge.s32.totalorder %s872_s12, 2  ;;  %s415_s15 = sand.u32 1, %s860_s9  }
 0x359   : > { %p1125_p13 = scmp.ne.s32.totalorder %s1115_s16, 0  ;;  %s416_s4 = scalar_lea.sflag [#allocation4], %s415_s15 }
 0x35b   : > { %p688_p3 = pnand %p694_p11, %p1125_p13 }
 0x35d   : > { %855 = dma.done.wait (!%p688_p3), %s416_s4, 256  }
 0x35e   : > { %857 = vsyncadd (!%p688_p3), %s416_s4, 4294967040  ;;  %p16_p7 = scmp.ge.s32.totalorder %s949_s21, 5   ;;  %s1126_s9 = smov %s864_s10 }
 0x35f   : > { %s1127_s10 = smov %s868_s11  ;;  %s1128_s11 = smov %s978_s8 }
 0x360   : > { %s1129_s12 = smov %s949_s21  ;;  %18 = sbr.rel (!%p16_p7) target bundleno = 6 (0x6), region = 77 }
 0x367   :  { %421 = vsyncpa [#allocation3], 1 }
 0x368   :  { %423 = vsyncpa [#allocation3 + $0x1], 1 }
 0x369   :  { %424 = vsyncpa [#allocation6], 1 }
 0x36a   :  { %425 = vsyncpa [#allocation4], 1 }
 0x36b   :  { %427 = vsyncpa [#allocation4 + $0x1], 1 }

// kernel: tpu_custom_call.1
= control target key start
LH: loop header
LB: loop body
LE: loop exit
PB: predicated region body
PF: predicated region fallthrough
CT: control target
= control target key end

     0   :  { %7 = vsyncpa [#allocation3], 0  ;;  %s1108_s0 = inlined_call_operand.hbm [shape: f32[48,128], index: 0, kind: input, shape index: {}]   ;;  %s1109_s1 = inlined_call_operand.hbm [shape: f32[128,128], index: 1, kind: input, shape index: {}]   ;;  %s1110_s2 = inlined_call_operand.hbm [shape: f32[48,128], index: 2, kind: output, shape index: {}]  }
   0x1   :  { %9 = vsyncpa [#allocation3 + $0x1], 0 }
   0x2   :  { %10 = vsyncpa [#allocation6], 0 }
   0x3   :  { %11 = vsyncpa [#allocation4], 0 }
   0x4   :  { %13 = vsyncpa [#allocation4 + $0x1], 0  ;;  %s896_s9 = smov 0   ;;  %s898_s10 = smov 0  }
   0x5   :  { %s900_s11 = smov 0   ;;  %s902_s12 = smov 0  }
   0x6 LB: > { %s917_s13 = sadd.s32 4294967295, %s872_s12   ;;  %s483_s14 = sadd.s32 4294967294, %s872_s12   ;;  %s872_s12 = sphi %s902_s12, %s1129_s12   ;;  %s868_s11 = sphi %s900_s11, %s1128_s11   ;;  %s864_s10 = sphi %s898_s10, %s1127_s10   ;;  %s860_s9 = sphi %s896_s9, %s1126_s9  }
   0x7   : > { %p39_p0 = scmp.ne.s32.totalorder %s864_s10, %s860_s9  ;;  %p1111_p1 = scmp.eq.s32.totalorder %s917_s13, 0 }
   0x8   : > { %p90_p3 = scmp.eq.s32.totalorder %s483_s14, 2  ;;  %p484_p5 = scmp.ge.s32.totalorder %s872_s12, 1 }
   0x9   : > { %p926_p4 = por %p1111_p1, %p39_p0  ;;  %p97_p7 = scmp.lt.s32.totalorder %s872_s12, 4 }
   0xa   : > { %p931_p6 = por %p90_p3, %p39_p0  ;;  %s874_s18 = smov [#allocation5]  }
   0xb   : > { %s1114_s15 = scalar_select %p926_p4, 1, 0 }
   0xc   : > { %s1115_s16 = scalar_select %p931_p6, 1, 0 }
   0xd   : > { %p936_p8 = pnand %p484_p5, %p97_p7  ;;  %s109_s19 = sshll.u32 %s874_s18, 4  ;;  %s110_s19 = int_to_ptr.vmem [resolvable:$true] %s109_s19 }
   0xe   : > { %s949_s21 = sadd.s32 1, %s872_s12   ;;  %s26_s22 = sadd.s32 1, %s868_s11 }
   0xf   : > { %s1116_s17 = scalar_select %p936_p8, 1, 0 }
  0x10   : > { %p679_p9 = pneg %p936_p8  ;;  %s23_s23 = ssub.s32 %s872_s12, %s949_s21 }
  0x11   : > { %s744_s26 = scalar_lea.hbm %s1109_s1, 2048 }
  0x12   : > { %p944_p10 = pnand %p679_p9, %p1111_p1  ;;  %p745_p11 = scmp.ne.s32.totalorder %s1109_s1, %s744_s26 }
  0x13   : > { %p751_p3 = scmp.lt.u32.totalorder %s744_s26, %s1109_s1 }
  0x14   : > { %p746_p12 = pneg %p944_p10 }
  0x16   : > { %p747_p13 = pnand %p746_p12, %p745_p11 }
  0x18   : > { %p748_p0 = pneg %p747_p13 }
  0x1a   : > { %p753_p5 = pnand %p751_p3, %p748_p0 }
  0x1c   : > { %756 = shalt.err (!%p753_p5)
}
  0x1d   : > { %s757_s3 = scalar_lea.vmem %s110_s19, 2048  ;;  %p765_p2 = scmp.lt.s32.totalorder %s110_s19, %s110_s19 }
  0x1e   : > { %p758_p7 = scmp.ne.s32.totalorder %s110_s19, %s757_s3  ;;  %p766_p6 = scmp.lt.s32.totalorder %s757_s3, %s757_s3 }
  0x20   : > { %p760_p9 = pnand %p758_p7, %p746_p12  ;;  %p767_p4 = por %p766_p6, %p765_p2 }
  0x22   : > { %p761_p1 = pneg %p760_p9 }
  0x24   : > { %p768_p8 = pnand %p767_p4, %p761_p1 }
  0x26   : > { %771 = shalt.err (!%p768_p8)
}
  0x27   : > { %s875_s4 = smov 128   ;;  %s876_s5 = smov 8  }
  0x28   : > { %682 = dma.hbm_to_vmem [thread:$0]  (!%p944_p10), %s1109_s1, 2048, %s110_s19, [#allocation6], %s875_s4, %s875_s4, %s876_s5  }
  0x29   : > { %p24_p1 = scmp.eq.s32.totalorder %s23_s23, 0  ;;  %p33_p2 = scmp.ne.s32.totalorder %s868_s11, %s864_s10 }
  0x2a   : > { %p34_p4 = scmp.eq.s32.totalorder %s872_s12, 0  ;;  %p692_p6 = scmp.lt.s32.totalorder %s872_s12, 3 }
  0x2b   : > { %s978_s8 = scalar_select %p24_p1, %s868_s11, %s26_s22  }
  0x2c   : > { %p35_p8 = por %p34_p4, %p33_p2  ;;  %p1118_p11 = scmp.eq.s32.totalorder %s917_s13, 2 }
  0x2d   : > { %s123_s18 = sand.u32 1, %s868_s11   ;;  %s499_s20 = sshll.u32 %s872_s12, 8 }
  0x2e   : > { %p982_p12 = por %p1118_p11, %p33_p2  ;;  %s487_s24 = sshll.u32 %s123_s18, 4 }
  0x2f   : > { %s991_s27 = scalar_lea.hbm %s1108_s0, %s499_s20  ;;  %s127_s19 = scalar_lea.vmem [#allocation2], %s487_s24 }
  0x30   : > { %s134_s22 = sshll.u32 %s127_s19, 4  ;;  %p993_p10 = pnand %p692_p6, %p35_p8  ;;  %s997_s22 = int_to_ptr.vmem [resolvable:$true] %s134_s22 }
  0x31   : > { %s999_s28 = scalar_lea.sflag [#allocation3], %s123_s18  ;;  %s772_s29 = scalar_lea.hbm %s991_s27, 256 }
  0x32   : > { %p773_p13 = scmp.ne.s32.totalorder %s991_s27, %s772_s29  ;;  %p774_p0 = pneg %p993_p10 }
  0x33   : > { %s777_s6 = scalar_lea.hbm %s1108_s0, 768  ;;  %p778_p7 = scmp.lt.u32.totalorder %s991_s27, %s1108_s0 }
  0x34   : > { %p775_p3 = pnand %p774_p0, %p773_p13  ;;  %p779_p9 = scmp.lt.u32.totalorder %s777_s6, %s772_s29 }
  0x35   : > { %p781_p2 = scmp.lt.u32.totalorder %s772_s29, %s991_s27 }
  0x36   : > { %p776_p5 = pneg %p775_p3  ;;  %p780_p1 = por %p779_p9, %p778_p7 }
  0x38   : > { %p782_p4 = por %p781_p2, %p780_p1 }
  0x3a   : > { %p783_p6 = pnand %p782_p4, %p776_p5 }
  0x3c   : > { %786 = shalt.err (!%p783_p6)
}
  0x3d   : > { %s787_s18 = scalar_lea.vmem %s997_s22, 256  ;;  %s877_s24 = smov [#allocation2]  }
  0x3e   : > { %p788_p8 = scmp.ne.s32.totalorder %s997_s22, %s787_s18  ;;  %s792_s25 = sshll.u32 %s877_s24, 4  ;;  %s793_s25 = int_to_ptr.vmem [resolvable:$false] %s792_s25 }
  0x3f   : > { %s794_s26 = scalar_lea.vmem %s793_s25, 512  ;;  %p795_p3 = scmp.lt.s32.totalorder %s997_s22, %s793_s25 }
  0x40   : > { %p790_p11 = pnand %p788_p8, %p774_p0  ;;  %p796_p7 = scmp.lt.s32.totalorder %s794_s26, %s787_s18 }
  0x42   : > { %p791_p13 = pneg %p790_p11  ;;  %p797_p9 = por %p796_p7, %p795_p3 }
  0x44   : > { %p798_p1 = pnand %p797_p9, %p791_p13 }
  0x46   : > { %801 = shalt.err (!%p798_p1)
}
  0x47   : > { %686 = dma.hbm_to_vmem [thread:$0]  (!%p993_p10), %s991_s27, 256, %s997_s22, %s999_s28, %s875_s4, %s875_s4, %s876_s5  }
  0x48   : > { %p1121_p0 = scmp.ne.s32.totalorder %s1116_s17, 0 }
  0x49   : > { %s1033_s19 = sand.u32 (!%p1121_p0), 1, %s864_s10   ;;  %p1122_p5 = scmp.ne.s32.totalorder (!%p1121_p0), %s1114_s15, 0 }
  0x4a   : > { %146 = sbr.rel (%p1121_p0) target bundleno = 856 (0x358), region = 28  ;;  %s491_s29 = sshll.u32 (!%p1121_p0), %s1033_s19, 4 }
  0x4b   : > { %s149_s30 = scalar_lea.sflag (!%p1121_p0), [#allocation3], %s1033_s19  ;;  %s152_s23 = scalar_lea.vmem (!%p1121_p0), [#allocation2], %s491_s29 }
  0x51   : > { %847 = dma.done.wait (%p1122_p5), %s149_s30, 256  }
  0x52   : > { %849 = vsyncadd (%p1122_p5), %s149_s30, 4294967040  ;;  %p1123_p10 = scmp.eq.s32.totalorder %s917_s13, 0 }
  0x54   : > { %851 = dma.done.wait (%p1123_p10), [#allocation6], 2048   ;;  %p1124_p2 = pmov %p1123_p10 }
  0x55   : > { %v1047_v0 = vld [vmem:[%s152_s23] sm:$0xff]  ;;  %v1049_v1 = vld [vmem:[%s152_s23 + $0x8] sm:$0xff]  ;;  %v286_v38 = vlaneseq  ;;  %s176_s15 = scalar_lea.vmem [#allocation7], %s491_s29  ;;  %s500_s4 = sshll.u32 %s917_s13, 8 }
  0x56   : > { %853 = vsyncadd (%p1124_p2), [#allocation6], 4294965248  ;;  %v181_v2 = vld [vmem:[#allocation5] sm:$0xff]  ;;  %v197_v3 = vmul.f32 %v1047_v0, %v1047_v0  ;;  %v182_v4 = vld [vmem:[#allocation5 + $0x8] sm:$0xff]  ;;  %v198_v9 = vmul.f32 %v1049_v1, %v1049_v1  ;;  %s400_s17 = sshll.u32 %s176_s15, 4  ;;  %s1065_s22 = scalar_lea.hbm %s1110_s2, %s500_s4  ;;  %s1060_s17 = int_to_ptr.vmem [resolvable:$true] %s400_s17 }
  0x57   : > { %v183_v5 = vld [vmem:[#allocation5 + $0x10] sm:$0xff]  ;;  %v184_v6 = vld [vmem:[#allocation5 + $0x18] sm:$0xff]  ;;  %v607_v7 = vpack.c.bf16 %v182_v4, %v181_v2  ;;  %v185_v10 = vld [vmem:[#allocation5 + $0x20] sm:$0xff]  ;;  %v287_v39 = vand.u32 127, %v286_v38  ;;  %s387_s28 = scalar_lea.sflag [#allocation4], %s1033_s19  ;;  %s802_s13 = scalar_lea.vmem %s1060_s17, 256 }
  0x58   : > { %v611_v8 = vpack.c.bf16 %v184_v6, %v183_v5  ;;  %199 = vadd.xlane.f32.xlu0 %v197_v3  ;;  %v186_v11 = vld [vmem:[#allocation5 + $0x28] sm:$0xff]  ;;  %v187_v13 = vld [vmem:[#allocation5 + $0x30] sm:$0xff]  ;;  %v188_v14 = vld [vmem:[#allocation5 + $0x38] sm:$0xff]  ;;  %p803_p4 = scmp.ne.s32.totalorder %s1060_s17, %s802_s13  ;;  %s878_s3 = smov [#allocation7]  }
  0x59   : > { %608 = vmatprep.subr.bf16.mxu0 %v607_v7  ;;  %640 = vmatprep.subr.bf16.mxu1 %v607_v7  ;;  %v615_v12 = vpack.c.bf16 %v186_v11, %v185_v10  ;;  %v619_v15 = vpack.c.bf16 %v188_v14, %v187_v13  ;;  %v189_v16 = vld [vmem:[#allocation5 + $0x40] sm:$0xff]  ;;  %v190_v17 = vld [vmem:[#allocation5 + $0x48] sm:$0xff]  ;;  %v191_v19 = vld [vmem:[#allocation5 + $0x50] sm:$0xff]  ;;  %vm288_vm0 = vcmp.lt.s32.totalorder %v287_v39, 16  ;;  %s806_s6 = sshll.u32 %s878_s3, 4  ;;  %s807_s6 = int_to_ptr.vmem [resolvable:$false] %s806_s6 }
  0x5a   : > { %610 = vmatpush3.bf16.xpose.msra.mxu0 %v607_v7  ;;  %642 = vmatpush3.bf16.msra.mxu1 %v607_v7  ;;  %v623_v18 = vpack.c.bf16 %v190_v17, %v189_v16  ;;  %v192_v20 = vld [vmem:[#allocation5 + $0x58] sm:$0xff]  ;;  %v193_v22 = vld [vmem:[#allocation5 + $0x60] sm:$0xff]  ;;  %v194_v23 = vld [vmem:[#allocation5 + $0x68] sm:$0xff]  ;;  %p804_p6 = pnand %p803_p4, %p982_p12  ;;  %s808_s7 = scalar_lea.vmem %s807_s6, 512 }
  0x5b   : > { %612 = vmatprep.subr.bf16.mxu0 %v611_v8  ;;  %644 = vmatprep.subr.bf16.mxu1 %v611_v8  ;;  %v627_v21 = vpack.c.bf16 %v192_v20, %v191_v19  ;;  %v631_v24 = vpack.c.bf16 %v194_v23, %v193_v22  ;;  %v195_v25 = vld [vmem:[#allocation5 + $0x70] sm:$0xff]  ;;  %v196_v26 = vld [vmem:[#allocation5 + $0x78] sm:$0xff]  ;;  %p809_p11 = scmp.lt.s32.totalorder %s1060_s17, %s807_s6  ;;  %p810_p13 = scmp.lt.s32.totalorder %s808_s7, %s802_s13 }
  0x5c   : > { %201 = vadd.xlane.f32.xlu0 %v198_v9  ;;  %v635_v27 = vpack.c.bf16 %v196_v26, %v195_v25  ;;  %p805_p8 = pneg %p804_p6 }
  0x5d   : > { %p811_p3 = por %p810_p13, %p809_p11 }
  0x5e   : > { %646 = vmatpush3.bf16.msra.mxu1 %v611_v8 }
  0x5f   : > { %648 = vmatprep.subr.bf16.mxu1 %v615_v12  ;;  %p812_p7 = pnand %p811_p3, %p805_p8 }
  0x62   : > { %614 = vmatpush3.bf16.xpose.msra.mxu0 %v611_v8  ;;  %650 = vmatpush3.bf16.msra.mxu1 %v615_v12 }
  0x63   : > { %616 = vmatprep.subr.bf16.mxu0 %v615_v12  ;;  %652 = vmatprep.subr.bf16.mxu1 %v619_v15 }
  0x66   : > { %654 = vmatpush3.bf16.msra.mxu1 %v619_v15 }
  0x67   : > { %656 = vmatprep.subr.bf16.mxu1 %v623_v18 }
  0x6a   : > { %618 = vmatpush3.bf16.xpose.msra.mxu0 %v615_v12  ;;  %658 = vmatpush3.bf16.msra.mxu1 %v623_v18 }
  0x6b   : > { %620 = vmatprep.subr.bf16.mxu0 %v619_v15  ;;  %660 = vmatprep.subr.bf16.mxu1 %v627_v21 }
  0x6e   : > { %662 = vmatpush3.bf16.msra.mxu1 %v627_v21 }
  0x6f   : > { %664 = vmatprep.subr.bf16.mxu1 %v631_v24 }
  0x72   : > { %622 = vmatpush3.bf16.xpose.msra.mxu0 %v619_v15  ;;  %666 = vmatpush3.bf16.msra.mxu1 %v631_v24 }
  0x73   : > { %624 = vmatprep.subr.bf16.mxu0 %v623_v18  ;;  %668 = vmatprep.subr.bf16.mxu1 %v635_v27 }
  0x76   : > { %670 = vmatpush3.bf16.msra.mxu1 %v635_v27 }
  0x7a   : > { %626 = vmatpush3.bf16.xpose.msra.mxu0 %v623_v18 }
  0x7b   : > { %628 = vmatprep.subr.bf16.mxu0 %v627_v21 }
  0x82   : > { %630 = vmatpush3.bf16.xpose.msra.mxu0 %v627_v21 }
  0x83   : > { %632 = vmatprep.subr.bf16.mxu0 %v631_v24 }
  0x8a   : > { %634 = vmatpush3.bf16.xpose.msra.mxu0 %v631_v24 }
  0x8b   : > { %636 = vmatprep.subr.bf16.mxu0 %v635_v27 }
  0x92   : > { %638 = vmatpush3.bf16.xpose.msra.mxu0 %v635_v27 }
  0xe5   : > { %v200_v28 = vpop.xlane.xlu0 %199 }
  0xe6   : > { %v203_v29 = vmax.f32 %v200_v28, 1e-24 }
  0xe8   : > { %732 = vrsqrt.f32 %v203_v29 }
  0xe9   : > { %v202_v30 = vpop.xlane.xlu0 %201 }
  0xea   : > { %v204_v31 = vmax.f32 %v202_v30, 1e-24 }
  0xec   : > { %734 = vrsqrt.f32 %v204_v31 }
  0xf2   : > { %v733_v32 = vpop.eup %732 }
  0xf3   : > { %v207_v33 = vmul.f32 14.285714, %v733_v32 }
  0xf5   : > { %v209_v34 = vmul.f32 %v207_v33, %v1047_v0 }
  0xf6   : > { %v735_v35 = vpop.eup %734 }
  0xf7   : > { %v208_v36 = vmul.f32 14.285714, %v735_v35  ;;  %569 = vmatprep.mubr.f32.mxu0 %v209_v34 }
  0xf9   : > { %v210_v37 = vmul.f32 %v208_v36, %v1049_v1 }
  0xfb   : > { %570 = vmatmul.mubr.f32.vlgmr.msra.gmra.mrb[0].mxu0 %v210_v37 }
 0x1ce   : > { %v571_v40 = vpop.f32.mrb[0].mxu0 }
 0x1cf   : > { %v277_v41 = vpop.f32.mrb[1].mxu0  ;;  %v290_v43 = vsel %vm288_vm0, %v571_v40, -1e+30 }
 0x1d0   : > { %v289_v42 = vsel %vm288_vm0, %v277_v41, -1e+30 }
 0x1d1   : > { %291 = vmax.xlane.f32.xlu1 %v289_v42 }
 0x1d5   : > { %293 = vmax.xlane.f32.xlu1 %v290_v43 }
 0x25e   : > { %v292_v44 = vpop.xlane.xlu1 %291 }
 0x25f   : > { %v295_v45 = vsub.f32 %v289_v42, %v292_v44 }
 0x261   : > { %v297_v46 = vmul.f32 1.442695, %v295_v45 }
 0x262   : > { %v294_v47 = vpop.xlane.xlu1 %293 }
 0x263   : > { %736 = vpow2.f32 %v297_v46  ;;  %v296_v48 = vsub.f32 %v290_v43, %v294_v47 }
 0x265   : > { %v299_v49 = vmul.f32 1.442695, %v296_v48 }
 0x267   : > { %738 = vpow2.f32 %v299_v49 }
 0x26d   : > { %v737_v50 = vpop.eup %736 }
 0x26e   : > { %301 = vadd.xlane.f32.xlu0 %v737_v50  ;;  %604 = vmatprep.mubr.f32.mxu1 %v737_v50 }
 0x271   : > { %v739_v51 = vpop.eup %738 }
 0x272   : > { %303 = vadd.xlane.f32.xlu1 %v739_v51  ;;  %605 = vmatmul.mubr.f32.vlgmr.msra.gmra.mrb[0].mxu1 %v739_v51 }
 0x2fb   : > { %v302_v53 = vpop.xlane.xlu0 %301 }
 0x2ff   : > { %v304_v52 = vpop.xlane.xlu1 %303 }
 0x300   : > { %740 = vrcp.f32 %v304_v52 }
 0x301   : > { %742 = vrcp.f32 %v302_v53 }
 0x30a   : > { %v741_v54 = vpop.eup %740 }
 0x30b   : > { %v743_v56 = vpop.eup %742 }
 0x345   : > { %v606_v55 = vpop.f32.mrb[0].mxu1 }
 0x346   : > { %v383_v57 = vmul.f32 %v741_v54, %v606_v55  ;;  %v371_v58 = vpop.f32.mrb[1].mxu1 }
 0x347   : > { %v382_v59 = vmul.f32 %v743_v56, %v371_v58 }
 0x348   : > { %385 = vst [vmem:[%s176_s15 + $0x8] sm:$0xff] %v383_v57 }
 0x349   : > { %384 = vst [vmem:[%s176_s15] sm:$0xff] %v382_v59 }
 0x34a   : > { %815 = shalt.err (!%p812_p7)
}
 0x34b   : > { %s816_s20 = scalar_lea.hbm %s1065_s22, 256  ;;  %s820_s25 = scalar_lea.hbm %s1110_s2, 768 }
 0x34c   : > { %p817_p9 = scmp.ne.s32.totalorder %s1065_s22, %s816_s20  ;;  %p821_p5 = scmp.lt.u32.totalorder %s1065_s22, %s1110_s2 }
 0x34d   : > { %p822_p10 = scmp.lt.u32.totalorder %s820_s25, %s816_s20  ;;  %p824_p4 = scmp.lt.u32.totalorder %s816_s20, %s1065_s22 }
 0x34e   : > { %p818_p1 = pnand %p817_p9, %p982_p12 }
 0x34f   : > { %p823_p2 = por %p822_p10, %p821_p5 }
 0x350   : > { %p819_p0 = pneg %p818_p1 }
 0x351   : > { %p825_p6 = por %p824_p4, %p823_p2 }
 0x353   : > { %p826_p8 = pnand %p825_p6, %p819_p0 }
 0x355   : > { %829 = shalt.err (!%p826_p8)
}
 0x356   : > { %s879_s30 = smov 128   ;;  %s880_s23 = smov 8  }
 0x357   : > { %677 = dma.vmem_to_hbm [thread:$0]  (%p982_p12), %s1060_s17, 256, %s1065_s22, %s387_s28, %s879_s30, %s879_s30, %s880_s23  }
 0x358 PF: > { %p694_p11 = scmp.ge.s32.totalorder %s872_s12, 2  ;;  %s415_s15 = sand.u32 1, %s860_s9  }
 0x359   : > { %p1125_p13 = scmp.ne.s32.totalorder %s1115_s16, 0  ;;  %s416_s4 = scalar_lea.sflag [#allocation4], %s415_s15 }
 0x35b   : > { %p688_p3 = pnand %p694_p11, %p1125_p13 }
 0x35d   : > { %855 = dma.done.wait (!%p688_p3), %s416_s4, 256  }
 0x35e   : > { %857 = vsyncadd (!%p688_p3), %s416_s4, 4294967040  ;;  %p16_p7 = scmp.ge.s32.totalorder %s949_s21, 5   ;;  %s1126_s9 = smov %s864_s10 }
 0x35f   : > { %s1127_s10 = smov %s868_s11  ;;  %s1128_s11 = smov %s978_s8 }
 0x360   : > { %s1129_s12 = smov %s949_s21  ;;  %18 = sbr.rel (!%p16_p7) target bundleno = 6 (0x6), region = 77 }
 0x367   :  { %421 = vsyncpa [#allocation3], 1 }
 0x368   :  { %423 = vsyncpa [#allocation3 + $0x1], 1 }
 0x369   :  { %424 = vsyncpa [#allocation6], 1 }
 0x36a   :  { %425 = vsyncpa [#allocation4], 1 }
 0x36b   :  { %427 = vsyncpa [#allocation4 + $0x1], 1 }

</bundles_post_ra>
